<compile_context>
chip_gen: v7x
topology: tpu7x:2x2x1
jax: 0.10.0
libtpu: 0.0.40
codegen_flags: <defaults>
</compile_context>

<pallas_src>
import jax
import jax.numpy as jnp
from jax.experimental import pallas as pl
from jax.experimental.pallas import tpu as pltpu

_LANE = 128
_LANE_CAP = 4096            # max lane width per block
_BLOCK_BYTES_CAP = 4 << 20  # ~4 MiB per input/output block; live ~= 6x blocks ~= 24 MiB


def _mfm_kernel(a_ref, b_ref, o_ref):
    # a_ref, b_ref, o_ref: (r_tile, L) VMEM tiles
    o_ref[...] = jnp.maximum(a_ref[...], b_ref[...])


def _largest_divisor_multiple(dim: int, multiple: int, cap: int):
    """Largest t <= min(dim, cap) with t % multiple == 0 and dim % t == 0, else None."""
    cap = min(dim, cap)
    if cap < multiple or dim % multiple != 0:
        return None
    best = multiple
    for t in range(multiple, cap + 1, multiple):
        if dim % t == 0:
            best = t
    return best


def _plan_layout(total: int, itemsize: int, sub: int):
    """Pick a (R, L) view of a flat half of length `total`.

    Returns (R, L, total_padded) with L a multiple of 128 and R * L == total_padded.
    Prefers a no-padding layout when `total` is a multiple of 128 and the resulting
    rows are either sublane-tileable or small enough to take as one block.
    """
    if total % _LANE == 0:
        L = _largest_divisor_multiple(total, _LANE, _LANE_CAP)
        R = total // L
        if R % sub == 0 or R * L * itemsize <= _BLOCK_BYTES_CAP:
            return R, L, total
    # Padded path: L = 128 keeps padding waste minimal; pad rows up to a sublane
    # multiple so the row tile is always a legal (multiple-of-8) block.
    L = _LANE
    R = -(-total // L)
    if R > sub and R % sub != 0:
        R = -(-R // sub) * sub
    return R, L, R * L


def _pick_rows(R: int, sub: int, max_rows: int) -> int:
    """Row tile: largest multiple of `sub` dividing R with tile <= max_rows (byte cap).

    Falls back to the full extent only when the caller has guaranteed a full-R block
    fits the byte cap (enforced by _plan_layout).
    """
    if R % sub == 0:
        best = sub
        hi = min(R, max(max_rows, sub))
        for t in range(sub, hi + 1, sub):
            if R % t == 0:
                best = t
        return best
    return R


def max_feature_map_2d(x: jax.Array) -> jax.Array:
    """MaxFeatureMap2D(max_dim=1) forward. x: (B, C, H, W) with C even."""
    B, C, H, W = x.shape
    if C % 2 != 0:
        raise ValueError("MaxFeatureMap2D requires an even channel dimension")
    c_half = C // 2
    total = c_half * H * W
    itemsize = jnp.dtype(x.dtype).itemsize
    sub = max(8, 32 // itemsize)  # sublane multiple: 8 f32 / 16 bf16 / 32 int8

    R, L, total_p = _plan_layout(total, itemsize, sub)
    max_rows = max(1, _BLOCK_BYTES_CAP // (L * itemsize))
    r_tile = _pick_rows(R, sub, max_rows)

    # Free metadata reshape for row-major NCHW: (B, 2, c_half*H*W).
    x_flat = x.reshape(B, 2, total)
    if total_p != total:
        x_flat = jnp.pad(x_flat, ((0, 0), (0, 0), (0, total_p - total)))
    x_view = x_flat.reshape(B, 2, R, L)

    grid = (B, R // r_tile)

    # Both halves read the same HBM array; only the "half" axis of the index_map
    # differs. Leading size-1 dims are squeezed out of the kernel refs.
    first_spec = pl.BlockSpec((None, None, r_tile, L), lambda b, i: (b, 0, i, 0))
    second_spec = pl.BlockSpec((None, None, r_tile, L), lambda b, i: (b, 1, i, 0))
    out_spec = pl.BlockSpec((None, r_tile, L), lambda b, i: (b, i, 0))

    block_bytes = r_tile * L * itemsize
    # ~6 blocks live (2 ins + 1 out, double-buffered) + headroom; <= 48 MiB so it is
    # always below v7x's 64 MiB physical VMEM while overriding v5e's 16 MiB default.
    vmem_limit = int(min(48 << 20, max(32 << 20, 8 * block_bytes)))

    out_view = pl.pallas_call(
        _mfm_kernel,
        out_shape=jax.ShapeDtypeStruct((B, R, L), x.dtype),
        grid=grid,
        in_specs=[first_spec, second_spec],
        out_specs=out_spec,
        compiler_params=pltpu.CompilerParams(
            dimension_semantics=("parallel", "parallel"),
            vmem_limit_bytes=vmem_limit,
        ),
        cost_estimate=pl.CostEstimate(
            flops=B * total,
            transcendentals=0,
            bytes_accessed=3 * B * total * itemsize,  # read both halves, write one
        ),
    )(x_view, x_view)

    out_flat = out_view.reshape(B, total_p)
    if total_p != total:
        out_flat = out_flat[:, :total]
    return out_flat.reshape(B, c_half, H, W)


if __name__ == "__main__":
    key = jax.random.PRNGKey(0)
    B, C, H, W = 2, 4, 16, 16
    x = jax.random.normal(key, (B, C, H, W), dtype=jnp.float32)

    out = jax.block_until_ready(max_feature_map_2d(x))

    # Reference mirroring torch's x.view(B, 2, C//2, H, W).max(dim=1).values
    ref = jnp.max(x.reshape(B, 2, C // 2, H, W), axis=1)
    assert out.shape == (B, C // 2, H, W), out.shape
    assert out.dtype == x.dtype, out.dtype
    assert jnp.allclose(out, ref), "mismatch vs reference"

    print("KERNEL_OK")
</pallas_src>

<mosaic_0001>
module attributes {stable_mosaic.version = 11 : i64} {
  func.func @_mfm_kernel(%arg0: i32, %arg1: i32, %arg2: memref<1x1x1x512xf32, #tpu.memory_space<vmem>>, %arg3: memref<1x1x1x512xf32, #tpu.memory_space<vmem>>, %arg4: memref<1x1x512xf32, #tpu.memory_space<vmem>>) attributes {dimension_semantics = [#tpu.dimension_semantics<parallel>, #tpu.dimension_semantics<parallel>], iteration_bounds = array<i64: 2, 1>, scalar_prefetch = 0 : i64, scratch_operands = 0 : i64, tpu.core_type = #tpu.core_type<tc>, window_params = [{transform_indices = @transform_0, window_bounds = array<i64: 1, 1, 1, 512>}, {transform_indices = @transform_1, window_bounds = array<i64: 1, 1, 1, 512>}, {transform_indices = @transform_2, window_bounds = array<i64: 1, 1, 512>}]} {
    %c0 = arith.constant 0 : index
    %c0_0 = arith.constant 0 : index
    %c0_1 = arith.constant 0 : index
    %c0_2 = arith.constant 0 : index
    %0 = vector.load %arg2[%c0, %c0_0, %c0_1, %c0_2] : memref<1x1x1x512xf32, #tpu.memory_space<vmem>>, vector<1x1x1x512xf32>
    %1 = vector.shape_cast %0 : vector<1x1x1x512xf32> to vector<1x512xf32>
    %c0_3 = arith.constant 0 : index
    %c0_4 = arith.constant 0 : index
    %c0_5 = arith.constant 0 : index
    %c0_6 = arith.constant 0 : index
    %2 = vector.load %arg3[%c0_3, %c0_4, %c0_5, %c0_6] : memref<1x1x1x512xf32, #tpu.memory_space<vmem>>, vector<1x1x1x512xf32>
    %3 = vector.shape_cast %2 : vector<1x1x1x512xf32> to vector<1x512xf32>
    %4 = arith.maximumf %1, %3 : vector<1x512xf32>
    %c0_7 = arith.constant 0 : index
    %c0_8 = arith.constant 0 : index
    %c0_9 = arith.constant 0 : index
    %5 = vector.load %arg4[%c0_7, %c0_8, %c0_9] : memref<1x1x512xf32, #tpu.memory_space<vmem>>, vector<1x1x512xf32>
    %6 = vector.shape_cast %5 : vector<1x1x512xf32> to vector<1x512xf32>
    %7 = vector.shape_cast %4 : vector<1x512xf32> to vector<1x1x512xf32>
    tpu.vector_store %arg4[%c0_7, %c0_8, %c0_9], %7 {strides = array<i32>} : memref<1x1x512xf32, #tpu.memory_space<vmem>>, vector<1x1x512xf32>,
    return
  }
  func.func @transform_0(%arg0: i32, %arg1: i32) -> (i32, i32, i32, i32) {
    %c0_i32 = arith.constant 0 : i32
    %c0_i32_0 = arith.constant 0 : i32
    %c0_i32_1 = arith.constant 0 : i32
    return %arg0, %c0_i32, %arg1, %c0_i32_0 : i32, i32, i32, i32
  }
  func.func @transform_1(%arg0: i32, %arg1: i32) -> (i32, i32, i32, i32) {
    %c1_i32 = arith.constant 1 : i32
    %c0_i32 = arith.constant 0 : i32
    %c0_i32_0 = arith.constant 0 : i32
    return %arg0, %c1_i32, %arg1, %c0_i32 : i32, i32, i32, i32
  }
  func.func @transform_2(%arg0: i32, %arg1: i32) -> (i32, i32, i32) {
    %c0_i32 = arith.constant 0 : i32
    %c0_i32_0 = arith.constant 0 : i32
    return %arg0, %arg1, %c0_i32 : i32, i32, i32
  }
}

</mosaic_0001>

<bundles_post_ra>
// kernel: tpu_custom_call.1
= control target key start
LH: loop header
LB: loop body
LE: loop exit
PB: predicated region body
PF: predicated region fallthrough
CT: control target
= control target key end

     0   :  { %7 = vsyncpa [#allocation3], 0  ;;  %s832_s0 = inlined_call_operand.hbm [shape: f32[2,2,1,512], index: 0, kind: input, shape index: {}]   ;;  %s833_s1 = inlined_call_operand.hbm [shape: f32[2,2,1,512], index: 1, kind: input, shape index: {}]   ;;  %s834_s2 = inlined_call_operand.hbm [shape: f32[2,1,512], index: 2, kind: output, shape index: {}]  }
   0x1   :  { %9 = vsyncpa [#allocation3 + $0x1], 0 }
   0x2   :  { %10 = vsyncpa [#allocation6], 0 }
   0x3   :  { %12 = vsyncpa [#allocation6 + $0x1], 0 }
   0x4   :  { %13 = vsyncpa [#allocation4], 0 }
   0x5   :  { %15 = vsyncpa [#allocation4 + $0x1], 0  ;;  %s613_s9 = smov 0   ;;  %s615_s10 = smov 0  }
   0x6   :  { %s617_s11 = smov 0   ;;  %s619_s12 = smov 0  }
   0x7   :  { %s621_s13 = smov 0   ;;  %s623_s14 = smov 0  }
   0x8 LB: > { %s357_s15 = sadd.s32 4294967295, %s593_s14   ;;  %s358_s16 = sadd.s32 4294967294, %s593_s14   ;;  %s593_s14 = sphi %s623_s14, %s21_s14   ;;  %s589_s13 = sphi %s621_s13, %s854_s13   ;;  %s585_s12 = sphi %s619_s12, %s853_s12   ;;  %s581_s11 = sphi %s617_s11, %s852_s11   ;;  %s577_s10 = sphi %s615_s10, %s851_s10   ;;  %s573_s9 = sphi %s613_s9, %s850_s9  }
   0x9   : > { %s33_s17 = sadd.s32 1, %s589_s13  ;;  %s42_s18 = sadd.s32 1, %s581_s11 }
   0xa   : > { %p35_p0 = scmp.ge.s32.totalorder %s33_s17, 2  ;;  %p49_p1 = scmp.ne.s32.totalorder %s581_s11, %s577_s10 }
   0xb   : > { %p50_p2 = scmp.eq.s32.totalorder %s593_s14, 0  ;;  %p55_p3 = scmp.ne.s32.totalorder %s577_s10, %s573_s9 }
   0xc   : > { %s856_s17 = smov (%p35_p0, %s33_s17), 0  ;;  %p56_p5 = scmp.eq.s32.totalorder %s357_s15, 0 }
   0xd   : > { %p654_p4 = por %p50_p2, %p49_p1  ;;  %s37_s20 = ssub.s32 %s589_s13, %s856_s17 }
   0xe   : > { %p109_p6 = scmp.eq.s32.totalorder %s357_s15, 1  ;;  %p40_p7 = scmp.eq.s32.totalorder %s37_s20, 0 }
   0xf   : > { %p660_p8 = por %p56_p5, %p55_p3  ;;  %p115_p10 = scmp.eq.s32.totalorder %s358_s16, 1 }
  0x10   : > { %p664_p9 = por %p109_p6, %p49_p1  ;;  %p396_p13 = scmp.lt.s32.totalorder %s593_s14, 2 }
  0x11   : > { %s838_s21 = scalar_select %p660_p8, 1, 0 }
  0x12   : > { %s839_s22 = scalar_select %p664_p9, 1, 0 }
  0x13   : > { %s669_s23 = scalar_select %p40_p7, %s581_s11, %s42_s18  }
  0x14   : > { %p671_p11 = por %p115_p10, %p55_p3  ;;  %s678_s25 = sand.u32 1, %s581_s11  }
  0x15   : > { %s361_s26 = sshll.u32 %s678_s25, 2  ;;  %s376_s27 = sshll.u32 %s589_s13, 7 }
  0x16   : > { %s840_s24 = scalar_select %p671_p11, 1, 0 }
  0x17   : > { %s687_s30 = scalar_lea.hbm %s832_s0, %s376_s27  ;;  %s139_s3 = scalar_lea.vmem [#allocation2], %s361_s26 }
  0x18   : > { %s149_s4 = sshll.u32 %s139_s3, 4  ;;  %p695_p0 = pnand %p396_p13, %p654_p4  ;;  %s691_s4 = int_to_ptr.vmem [resolvable:$true] %s149_s4 }
  0x19   : > { %s136_s6 = scalar_lea.sflag [#allocation3], %s678_s25  ;;  %s446_s7 = scalar_lea.hbm %s687_s30, 64 }
  0x1a   : > { %p447_p3 = scmp.ne.s32.totalorder %s687_s30, %s446_s7  ;;  %p448_p5 = pneg %p695_p0 }
  0x1b   : > { %s451_s16 = scalar_lea.hbm %s832_s0, 256  ;;  %p452_p4 = scmp.lt.u32.totalorder %s687_s30, %s832_s0 }
  0x1c   : > { %p449_p6 = pnand %p448_p5, %p447_p3  ;;  %p453_p10 = scmp.lt.u32.totalorder %s451_s16, %s446_s7 }
  0x1d   : > { %p455_p12 = scmp.lt.u32.totalorder %s446_s7, %s687_s30 }
  0x1e   : > { %p450_p7 = pneg %p449_p6  ;;  %p454_p13 = por %p453_p10, %p452_p4 }
  0x20   : > { %p456_p1 = por %p455_p12, %p454_p13 }
  0x22   : > { %p457_p2 = pnand %p456_p1, %p450_p7 }
  0x24   : > { %460 = shalt.err (!%p457_p2)
}
  0x25   : > { %s461_s20 = scalar_lea.vmem %s691_s4, 64  ;;  %s595_s28 = smov [#allocation2]  }
  0x26   : > { %p462_p3 = scmp.ne.s32.totalorder %s691_s4, %s461_s20  ;;  %s466_s29 = sshll.u32 %s595_s28, 4  ;;  %s467_s29 = int_to_ptr.vmem [resolvable:$false] %s466_s29 }
  0x27   : > { %s468_s3 = scalar_lea.vmem %s467_s29, 128  ;;  %p469_p9 = scmp.lt.s32.totalorder %s691_s4, %s467_s29 }
  0x28   : > { %p464_p6 = pnand %p462_p3, %p448_p5  ;;  %p470_p4 = scmp.lt.s32.totalorder %s468_s3, %s461_s20 }
  0x2a   : > { %p465_p11 = pneg %p464_p6  ;;  %p471_p10 = por %p470_p4, %p469_p9 }
  0x2c   : > { %p472_p12 = pnand %p471_p10, %p465_p11 }
  0x2e   : > { %475 = shalt.err (!%p472_p12)
}
  0x2f   : > { %388 = dma.hbm_to_vmem [thread:$0]  (!%p695_p0), %s687_s30, 64, %s691_s4, %s136_s6  }
  0x30   : > { %p842_p1 = scmp.lt.s32.totalorder %s593_s14, 3  ;;  %p843_p2 = scmp.ge.s32.totalorder %s593_s14, 1 }
  0x31   : > { %s288_s16 = scalar_lea.hbm %s833_s1, %s376_s27  ;;  %s160_s18 = scalar_lea.vmem [#allocation5], %s361_s26 }
  0x32   : > { %p731_p7 = pnand %p843_p2, %p842_p1  ;;  %s171_s19 = sshll.u32 %s160_s18, 4  ;;  %s172_s19 = int_to_ptr.vmem [resolvable:$true] %s171_s19 }
  0x33   : > { %s742_s20 = scalar_lea.hbm %s288_s16, 64  ;;  %s157_s30 = scalar_lea.sflag [#allocation6], %s678_s25 }
  0x34   : > { %s844_s7 = scalar_select %p731_p7, 1, 0 }
  0x35   : > { %s506_s4 = scalar_lea.hbm %s288_s16, 128  ;;  %s481_s27 = scalar_lea.hbm %s833_s1, 256 }
  0x36   : > { %p477_p9 = scmp.ne.s32.totalorder %s742_s20, %s506_s4  ;;  %p482_p3 = scmp.lt.u32.totalorder %s742_s20, %s833_s1 }
  0x37   : > { %p483_p6 = scmp.lt.u32.totalorder %s481_s27, %s506_s4  ;;  %p485_p10 = scmp.lt.u32.totalorder %s506_s4, %s742_s20 }
  0x38   : > { %p479_p11 = pnand %p477_p9, %p448_p5 }
  0x39   : > { %p484_p4 = por %p483_p6, %p482_p3 }
  0x3a   : > { %p480_p13 = pneg %p479_p11 }
  0x3b   : > { %p486_p12 = por %p485_p10, %p484_p4 }
  0x3d   : > { %p487_p1 = pnand %p486_p12, %p480_p13 }
  0x3f   : > { %490 = shalt.err (!%p487_p1)
}
  0x40   : > { %s491_s25 = scalar_lea.vmem %s172_s19, 64  ;;  %s596_s3 = smov [#allocation5]  }
  0x41   : > { %p492_p2 = scmp.ne.s32.totalorder %s172_s19, %s491_s25  ;;  %s496_s8 = sshll.u32 %s596_s3, 4  ;;  %s497_s8 = int_to_ptr.vmem [resolvable:$false] %s496_s8 }
  0x42   : > { %s498_s15 = scalar_lea.vmem %s497_s8, 128  ;;  %p499_p8 = scmp.lt.s32.totalorder %s172_s19, %s497_s8 }
  0x43   : > { %p494_p9 = pnand %p492_p2, %p448_p5  ;;  %p500_p7 = scmp.lt.s32.totalorder %s498_s15, %s491_s25 }
  0x45   : > { %p495_p11 = pneg %p494_p9  ;;  %p501_p3 = por %p500_p7, %p499_p8 }
  0x47   : > { %p502_p6 = pnand %p501_p3, %p495_p11 }
  0x49   : > { %505 = shalt.err (!%p502_p6)
}
  0x4a   : > { %391 = dma.hbm_to_vmem [thread:$0]  (!%p695_p0), %s742_s20, 64, %s172_s19, %s157_s30  }
  0x4b   : > { %p845_p13 = scmp.ne.s32.totalorder %s844_s7, 0 }
  0x4c   : > { %s766_s16 = sand.u32 (!%p845_p13), 1, %s577_s10   ;;  %p846_p5 = scmp.ne.s32.totalorder (!%p845_p13), %s838_s21, 0 }
  0x4d   : > { %180 = sbr.rel (%p845_p13) target bundleno = 113 (0x71), region = 28  ;;  %s368_s18 = sshll.u32 (!%p845_p13), %s766_s16, 2 }
  0x4e   : > { %s183_s4 = scalar_lea.sflag (!%p845_p13), [#allocation3], %s766_s16  ;;  %s186_s6 = scalar_lea.vmem (!%p845_p13), [#allocation2], %s368_s18 }
  0x54   : > { %560 = dma.done.wait (%p846_p5), %s183_s4, 64  }
  0x55   : > { %562 = vsyncadd (%p846_p5), %s183_s4, 4294967232  ;;  %s192_s5 = scalar_lea.sflag [#allocation6], %s766_s16  ;;  %s195_s19 = scalar_lea.vmem [#allocation5], %s368_s18 }
  0x56   : > { %564 = dma.done.wait (%p846_p5), %s192_s5, 64  }
  0x57   : > { %566 = vsyncadd (%p846_p5), %s192_s5, 4294967232  ;;  %v224_v0 = vlaneseq  ;;  %s220_s7 = scalar_lea.vmem [#allocation7], %s368_s18  ;;  %s378_s30 = sshll.u32 %s585_s12, 6  ;;  %v221_v1 = vld [vmem:[%s186_s6] sm:$0xf] }
  0x58   : > { %s246_s20 = sshll.u32 %s220_s7, 4  ;;  %v222_v2 = vld [vmem:[%s195_s19] sm:$0xf]  ;;  %s785_s21 = scalar_lea.hbm %s834_s2, %s378_s30  ;;  %s780_s20 = int_to_ptr.vmem [resolvable:$true] %s246_s20 }
  0x59   : > { %vm226_vm0 = vcmp.lt.s32.totalorder %v224_v0, 512  ;;  %v223_v3 = vmax.f32 %v221_v1, %v222_v2  ;;  %s230_s29 = scalar_lea.sflag [#allocation4], %s766_s16  ;;  %s507_s26 = scalar_lea.vmem %s780_s20, 64 }
  0x5a   : > { %p508_p8 = scmp.ne.s32.totalorder %s780_s20, %s507_s26  ;;  %p847_p0 = scmp.ne.s32.totalorder %s839_s22, 0 }
  0x5b   : > { %228 = vst.msk [vmem:[%s220_s7] sm:$0xf] %vm226_vm0, %v223_v3  ;;  %s597_s12 = smov [#allocation7]  }
  0x5c   : > { %p509_p7 = pnand %p508_p8, %p847_p0  ;;  %s511_s25 = sshll.u32 %s597_s12, 4  ;;  %s512_s25 = int_to_ptr.vmem [resolvable:$false] %s511_s25 }
  0x5d   : > { %s513_s3 = scalar_lea.vmem %s512_s25, 128  ;;  %p514_p10 = scmp.lt.s32.totalorder %s780_s20, %s512_s25 }
  0x5e   : > { %p510_p4 = pneg %p509_p7  ;;  %p515_p12 = scmp.lt.s32.totalorder %s513_s3, %s507_s26 }
  0x60   : > { %p516_p1 = por %p515_p12, %p514_p10 }
  0x62   : > { %p517_p2 = pnand %p516_p1, %p510_p4 }
  0x64   : > { %520 = shalt.err (!%p517_p2)
}
  0x65   : > { %s521_s8 = scalar_lea.hbm %s785_s21, 64  ;;  %s525_s18 = scalar_lea.hbm %s834_s2, 128 }
  0x66   : > { %p522_p9 = scmp.ne.s32.totalorder %s785_s21, %s521_s8  ;;  %p526_p6 = scmp.lt.u32.totalorder %s785_s21, %s834_s2 }
  0x67   : > { %p527_p13 = scmp.lt.u32.totalorder %s525_s18, %s521_s8  ;;  %p529_p8 = scmp.lt.u32.totalorder %s521_s8, %s785_s21 }
  0x68   : > { %p523_p11 = pnand %p522_p9, %p847_p0 }
  0x69   : > { %p528_p5 = por %p527_p13, %p526_p6 }
  0x6a   : > { %p524_p3 = pneg %p523_p11 }
  0x6b   : > { %p530_p7 = por %p529_p8, %p528_p5 }
  0x6d   : > { %p531_p4 = pnand %p530_p7, %p524_p3 }
  0x6f   : > { %534 = shalt.err (!%p531_p4)
}
  0x70   : > { %383 = dma.vmem_to_hbm [thread:$0]  (%p847_p0), %s780_s20, 64, %s785_s21, %s230_s29  }
  0x71 PF: > { %s258_s5 = sand.u32 1, %s573_s9   ;;  %p848_p10 = scmp.ne.s32.totalorder %s840_s24, 0 }
  0x72   : > { %p849_p12 = scmp.ge.s32.totalorder %s593_s14, 2  ;;  %s259_s19 = scalar_lea.sflag [#allocation4], %s258_s5 }
  0x74   : > { %p393_p1 = pnand %p849_p12, %p848_p10 }
  0x76   : > { %568 = dma.done.wait (!%p393_p1), %s259_s19, 64  }
  0x77   : > { %570 = vsyncadd (!%p393_p1), %s259_s19, 4294967232  ;;  %s21_s14 = sadd.s32 1, %s593_s14   ;;  %s850_s9 = smov %s577_s10 }
  0x78   : > { %p18_p2 = scmp.ge.s32.totalorder %s21_s14, 4   ;;  %s851_s10 = smov %s581_s11 }
  0x79   : > { %s852_s11 = smov %s669_s23  ;;  %s853_s12 = smov %s589_s13 }
  0x7a   : > { %s854_s13 = smov %s856_s17  ;;  %20 = sbr.rel (!%p18_p2) target bundleno = 8 (0x8), region = 86 }
  0x81   :  { %264 = vsyncpa [#allocation3], 1 }
  0x82   :  { %266 = vsyncpa [#allocation3 + $0x1], 1 }
  0x83   :  { %267 = vsyncpa [#allocation6], 1 }
  0x84   :  { %269 = vsyncpa [#allocation6 + $0x1], 1 }
  0x85   :  { %270 = vsyncpa [#allocation4], 1 }
  0x86   :  { %272 = vsyncpa [#allocation4 + $0x1], 1 }

</bundles_post_ra>
